<compile_context>
chip_gen: v5e
topology: v5e:2x2
jax: 0.10.0
libtpu: 0.0.40
codegen_flags: <defaults>
</compile_context>

<pallas_src>
import functools

import jax
import jax.numpy as jnp
from jax.experimental import pallas as pl
from jax.experimental.pallas import tpu as pltpu


def _round_up(x, m):
    return (x + m - 1) // m * m


def _batch_tiling(B, block_b):
    """Pick (rows_per_tile, num_tiles) for the batch grid.

    * rows per tile are a multiple of 8 (f32 sublane granularity) unless the
      whole batch is a single exact tile,
    * at least two (an even number of) tiles whenever B >= 16 so both v7x
      TensorCores get work under dimension_semantics=("parallel",),
    * tiles capped at block_b; any ragged last tile is masked by Pallas.
    """
    n_tiles = pl.cdiv(B, block_b)
    if B >= 16:
        n_tiles = max(n_tiles, 2)          # keep both v7x TCs busy
        if n_tiles % 2:
            n_tiles += 1                   # balance the two cores
    if n_tiles == 1:
        return B, 1                        # single exact tile, no garbage rows
    tb = _round_up(pl.cdiv(B, n_tiles), 8)
    return tb, pl.cdiv(B, tb)


def _dual_mlp_kernel(t_ref, c_ref,
                     w1t_ref, b1t_ref,
                     w1c_ref, b1c_ref,
                     w2t_ref, w2c_ref, b2_ref,
                     w3_ref, b3_ref,
                     o_ref):
    """Fused DualInputMLP forward for one batch tile.

    Inputs arrive f32 and are cast to bf16 in-kernel (VPU) for the MXU dots;
    accumulation, bias adds and ReLU stay in f32.
    """
    bf16 = jnp.bfloat16

    t = t_ref[...].astype(bf16)
    c = c_ref[...].astype(bf16)

    # Title branch: (TB, D) @ (D, H) -> (TB, H), bias + ReLU.
    t_feat = jnp.dot(t, w1t_ref[...],
                     preferred_element_type=jnp.float32) + b1t_ref[...]
    t_feat = jnp.maximum(t_feat, 0.0)

    # Content branch: (TB, D) @ (D, H) -> (TB, H), bias + ReLU.
    c_feat = jnp.dot(c, w1c_ref[...],
                     preferred_element_type=jnp.float32) + b1c_ref[...]
    c_feat = jnp.maximum(c_feat, 0.0)

    # Combined layer without concat: relu(t @ w2[:H] + c @ w2[H:] + b2).
    h = (jnp.dot(t_feat.astype(bf16), w2t_ref[...],
                 preferred_element_type=jnp.float32)
         + jnp.dot(c_feat.astype(bf16), w2c_ref[...],
                   preferred_element_type=jnp.float32)
         + b2_ref[...])
    h = jnp.maximum(h, 0.0)

    # Output head: lane-padded w3 keeps the dot MXU-friendly; slice the real
    # classes off the in-VMEM value before the (tiny) store.
    logits = jnp.dot(h.astype(bf16), w3_ref[...],
                     preferred_element_type=jnp.float32)
    n_cls = o_ref.shape[-1]
    o_ref[...] = (logits[:, :n_cls] + b3_ref[...]).astype(o_ref.dtype)


def prepare_params(params):
    """One-time weight prep (outside the hot path): split w2 row-wise, cast
    matmul weights to bf16, lane-pad w3, keep biases in f32."""
    f32, bf16 = jnp.float32, jnp.bfloat16
    H = params["w1t"].shape[1]
    C = params["w3"].shape[1]
    c_pad = _round_up(max(C, 128), 128)
    w3 = params["w3"].astype(f32)
    if c_pad != C:
        w3 = jnp.pad(w3, ((0, 0), (0, c_pad - C)))
    return {
        "w1t": params["w1t"].astype(bf16),
        "b1t": params["b1t"].astype(f32),
        "w1c": params["w1c"].astype(bf16),
        "b1c": params["b1c"].astype(f32),
        "w2t": params["w2"][:H].astype(bf16),
        "w2c": params["w2"][H:].astype(bf16),
        "b2": params["b2"].astype(f32),
        "w3": w3.astype(bf16),          # (H, c_pad), lane-padded, bf16
        "b3": params["b3"].astype(f32),  # (1, C), unpadded (added post-slice)
    }


@functools.partial(jax.jit, static_argnames=("block_b",))
def dual_input_mlp(title_emb, content_emb, prep, *, block_b=512):
    """Run the fused DualInputMLP forward pass on TPU via Pallas."""
    B, D = title_emb.shape
    H = prep["w1t"].shape[1]
    c_pad = prep["w3"].shape[1]
    C = prep["b3"].shape[1]
    f32 = jnp.float32

    tb, num_tiles = _batch_tiling(B, block_b)
    grid = (num_tiles,)

    act_spec = pl.BlockSpec((tb, D), lambda i: (i, 0))
    out_spec = pl.BlockSpec((tb, C), lambda i: (i, 0))

    def resident(shape):
        # Same block every grid step -> DMA'd once, stays VMEM-resident.
        return pl.BlockSpec(shape, lambda i: (0, 0))

    # --- Advisory cost + explicit VMEM budget. -------------------------------
    flops = 2 * B * (2 * D * H + 2 * H * H + H * c_pad)
    weight_bytes = (2 * D * H + 2 * H * H + H * c_pad) * 2       # bf16
    bias_bytes = (3 * H + C) * 4                                 # f32
    bytes_accessed = (2 * B * D * 4                              # f32 activations in
                      + weight_bytes + bias_bytes
                      + B * C * 4)                               # f32 logits out
    act_tile_bytes = 2 * (2 * tb * D * 4)                        # 2 inputs x 2 buffers
    out_tile_bytes = 2 * tb * C * 4
    temp_bytes = 6 * tb * max(H, c_pad) * 4                      # f32/bf16 temporaries
    vmem_est = (2 * (weight_bytes + bias_bytes)                  # residents (x2-buffered)
                + act_tile_bytes + out_tile_bytes + temp_bytes)
    vmem_limit = int(min(max(vmem_est * 5 // 4, 32 * 1024 * 1024),
                         64 * 1024 * 1024))                      # <= v7x physical VMEM

    return pl.pallas_call(
        _dual_mlp_kernel,
        out_shape=jax.ShapeDtypeStruct((B, C), f32),
        grid=grid,
        in_specs=[
            act_spec, act_spec,
            resident((D, H)), resident((1, H)),
            resident((D, H)), resident((1, H)),
            resident((H, H)), resident((H, H)), resident((1, H)),
            resident((H, c_pad)), resident((1, C)),
        ],
        out_specs=out_spec,
        compiler_params=pltpu.CompilerParams(
            dimension_semantics=("parallel",),
            vmem_limit_bytes=vmem_limit),
        cost_estimate=pl.CostEstimate(
            flops=flops, transcendentals=0, bytes_accessed=bytes_accessed),
    )(title_emb, content_emb,
      prep["w1t"], prep["b1t"],
      prep["w1c"], prep["b1c"],
      prep["w2t"], prep["w2c"], prep["b2"],
      prep["w3"], prep["b3"])


def init_params(key, input_dim, hidden_dim, num_classes):
    """Deterministic PyTorch-style (uniform +/- 1/sqrt(fan_in)) init, f32."""
    def linear(k, fan_in, fan_out):
        kw, kb = jax.random.split(k)
        bound = 1.0 / jnp.sqrt(fan_in)
        w = jax.random.uniform(kw, (fan_in, fan_out), jnp.float32, -bound, bound)
        b = jax.random.uniform(kb, (1, fan_out), jnp.float32, -bound, bound)
        return w, b

    k1, k2, k3, k4 = jax.random.split(key, 4)
    w1t, b1t = linear(k1, input_dim, hidden_dim)
    w1c, b1c = linear(k2, input_dim, hidden_dim)
    w2, b2 = linear(k3, 2 * hidden_dim, hidden_dim)
    w3, b3 = linear(k4, hidden_dim, num_classes)
    return {"w1t": w1t, "b1t": b1t,
            "w1c": w1c, "b1c": b1c,
            "w2": w2, "b2": b2,
            "w3": w3, "b3": b3}


def reference(title_emb, content_emb, p):
    """Pure-JAX reference: f32 math with the same bf16-rounded weights."""
    q = lambda w: w.astype(jnp.bfloat16).astype(jnp.float32)
    t = jax.nn.relu(title_emb @ q(p["w1t"]) + p["b1t"])
    c = jax.nn.relu(content_emb @ q(p["w1c"]) + p["b1c"])
    comb = jnp.concatenate([t, c], axis=1)
    h = jax.nn.relu(comb @ q(p["w2"]) + p["b2"])
    return h @ q(p["w3"]) + p["b3"]


if __name__ == "__main__":
    # Small shapes consistent with the module (scaled-down input/hidden dims);
    # B=16 exercises the 2-tile ("parallel") batch grid exactly.
    B, INPUT_DIM, HIDDEN_DIM, NUM_CLASSES = 16, 256, 128, 1

    key = jax.random.PRNGKey(0)
    k_params, k_title, k_content = jax.random.split(key, 3)

    params = init_params(k_params, INPUT_DIM, HIDDEN_DIM, NUM_CLASSES)
    prep = prepare_params(params)   # one-time split/cast/pad of the weights
    title_emb = jax.random.normal(k_title, (B, INPUT_DIM), jnp.float32)
    content_emb = jax.random.normal(k_content, (B, INPUT_DIM), jnp.float32)

    # TODO(synk): nn.Dropout(0.3) is treated as identity (eval-mode); training
    # mode dropout would need pltpu.prng_* inside the kernel.
    out = dual_input_mlp(title_emb, content_emb, prep)
    out = jax.block_until_ready(out)

    ref = reference(title_emb, content_emb, params)
    assert out.shape == (B, NUM_CLASSES), out.shape
    # bf16 matmul operands / bf16 inter-layer activations -> loosened tolerance.
    assert jnp.allclose(out, ref, atol=2e-2, rtol=2e-2), (out, ref)

    print("KERNEL_OK")
</pallas_src>

<mosaic_0001>
module attributes {stable_mosaic.version = 11 : i64} {
  func.func @_dual_mlp_kernel(%arg0: i32, %arg1: memref<8x256xf32, #tpu.memory_space<vmem>>, %arg2: memref<8x256xf32, #tpu.memory_space<vmem>>, %arg3: memref<256x128xbf16, #tpu.memory_space<vmem>>, %arg4: memref<1x128xf32, #tpu.memory_space<vmem>>, %arg5: memref<256x128xbf16, #tpu.memory_space<vmem>>, %arg6: memref<1x128xf32, #tpu.memory_space<vmem>>, %arg7: memref<128x128xbf16, #tpu.memory_space<vmem>>, %arg8: memref<128x128xbf16, #tpu.memory_space<vmem>>, %arg9: memref<1x128xf32, #tpu.memory_space<vmem>>, %arg10: memref<128x128xbf16, #tpu.memory_space<vmem>>, %arg11: memref<1x1xf32, #tpu.memory_space<vmem>>, %arg12: memref<8x1xf32, #tpu.memory_space<vmem>>) attributes {dimension_semantics = [#tpu.dimension_semantics<parallel>], iteration_bounds = array<i64: 2>, scalar_prefetch = 0 : i64, scratch_operands = 0 : i64, tpu.core_type = #tpu.core_type<tc>, window_params = [{transform_indices = @transform_0, window_bounds = array<i64: 8, 256>}, {transform_indices = @transform_1, window_bounds = array<i64: 8, 256>}, {pipeline_mode = #tpu.pipeline_mode<synchronous>, transform_indices = @transform_2, window_bounds = array<i64: 256, 128>}, {pipeline_mode = #tpu.pipeline_mode<synchronous>, transform_indices = @transform_3, window_bounds = array<i64: 1, 128>}, {pipeline_mode = #tpu.pipeline_mode<synchronous>, transform_indices = @transform_4, window_bounds = array<i64: 256, 128>}, {pipeline_mode = #tpu.pipeline_mode<synchronous>, transform_indices = @transform_5, window_bounds = array<i64: 1, 128>}, {pipeline_mode = #tpu.pipeline_mode<synchronous>, transform_indices = @transform_6, window_bounds = array<i64: 128, 128>}, {pipeline_mode = #tpu.pipeline_mode<synchronous>, transform_indices = @transform_7, window_bounds = array<i64: 128, 128>}, {pipeline_mode = #tpu.pipeline_mode<synchronous>, transform_indices = @transform_8, window_bounds = array<i64: 1, 128>}, {pipeline_mode = #tpu.pipeline_mode<synchronous>, transform_indices = @transform_9, window_bounds = array<i64: 128, 128>}, {pipeline_mode = #tpu.pipeline_mode<synchronous>, transform_indices = @transform_10, window_bounds = array<i64: 1, 1>}, {transform_indices = @transform_11, window_bounds = array<i64: 8, 1>}]} {
    %c0 = arith.constant 0 : index
    %c0_0 = arith.constant 0 : index
    %0 = vector.load %arg1[%c0, %c0_0] : memref<8x256xf32, #tpu.memory_space<vmem>>, vector<8x256xf32>
    %1 = arith.truncf %0 : vector<8x256xf32> to vector<8x256xbf16>
    %c0_1 = arith.constant 0 : index
    %c0_2 = arith.constant 0 : index
    %2 = vector.load %arg2[%c0_1, %c0_2] : memref<8x256xf32, #tpu.memory_space<vmem>>, vector<8x256xf32>
    %3 = arith.truncf %2 : vector<8x256xf32> to vector<8x256xbf16>
    %c0_3 = arith.constant 0 : index
    %c0_4 = arith.constant 0 : index
    %4 = vector.load %arg3[%c0_3, %c0_4] : memref<256x128xbf16, #tpu.memory_space<vmem>>, vector<256x128xbf16>
    %cst = arith.constant dense<0.000000e+00> : vector<8x128xf32>
    %5 = tpu.matmul %1, %4, %cst {dimension_numbers = #tpu.dot_dimension_numbers<[1], [0], [0], [1], [0, 0, 1, 1], [], []>} : vector<8x256xbf16>, vector<256x128xbf16>, vector<8x128xf32> -> vector<8x128xf32>
    %c0_5 = arith.constant 0 : index
    %c0_6 = arith.constant 0 : index
    %6 = vector.load %arg4[%c0_5, %c0_6] : memref<1x128xf32, #tpu.memory_space<vmem>>, vector<1x128xf32>
    %7 = vector.broadcast %6 : vector<1x128xf32> to vector<8x128xf32>
    %8 = arith.addf %5, %7 : vector<8x128xf32>
    %cst_7 = arith.constant 0.000000e+00 : f32
    %9 = vector.broadcast %cst_7 : f32 to vector<8x128xf32>
    %10 = arith.maximumf %8, %9 : vector<8x128xf32>
    %c0_8 = arith.constant 0 : index
    %c0_9 = arith.constant 0 : index
    %11 = vector.load %arg5[%c0_8, %c0_9] : memref<256x128xbf16, #tpu.memory_space<vmem>>, vector<256x128xbf16>
    %cst_10 = arith.constant dense<0.000000e+00> : vector<8x128xf32>
    %12 = tpu.matmul %3, %11, %cst_10 {dimension_numbers = #tpu.dot_dimension_numbers<[1], [0], [0], [1], [0, 0, 1, 1], [], []>} : vector<8x256xbf16>, vector<256x128xbf16>, vector<8x128xf32> -> vector<8x128xf32>
    %c0_11 = arith.constant 0 : index
    %c0_12 = arith.constant 0 : index
    %13 = vector.load %arg6[%c0_11, %c0_12] : memref<1x128xf32, #tpu.memory_space<vmem>>, vector<1x128xf32>
    %14 = vector.broadcast %13 : vector<1x128xf32> to vector<8x128xf32>
    %15 = arith.addf %12, %14 : vector<8x128xf32>
    %cst_13 = arith.constant 0.000000e+00 : f32
    %16 = vector.broadcast %cst_13 : f32 to vector<8x128xf32>
    %17 = arith.maximumf %15, %16 : vector<8x128xf32>
    %18 = arith.truncf %10 : vector<8x128xf32> to vector<8x128xbf16>
    %c0_14 = arith.constant 0 : index
    %c0_15 = arith.constant 0 : index
    %19 = vector.load %arg7[%c0_14, %c0_15] : memref<128x128xbf16, #tpu.memory_space<vmem>>, vector<128x128xbf16>
    %cst_16 = arith.constant dense<0.000000e+00> : vector<8x128xf32>
    %20 = tpu.matmul %18, %19, %cst_16 {dimension_numbers = #tpu.dot_dimension_numbers<[1], [0], [0], [1], [0, 0, 1, 1], [], []>} : vector<8x128xbf16>, vector<128x128xbf16>, vector<8x128xf32> -> vector<8x128xf32>
    %21 = arith.truncf %17 : vector<8x128xf32> to vector<8x128xbf16>
    %c0_17 = arith.constant 0 : index
    %c0_18 = arith.constant 0 : index
    %22 = vector.load %arg8[%c0_17, %c0_18] : memref<128x128xbf16, #tpu.memory_space<vmem>>, vector<128x128xbf16>
    %cst_19 = arith.constant dense<0.000000e+00> : vector<8x128xf32>
    %23 = tpu.matmul %21, %22, %cst_19 {dimension_numbers = #tpu.dot_dimension_numbers<[1], [0], [0], [1], [0, 0, 1, 1], [], []>} : vector<8x128xbf16>, vector<128x128xbf16>, vector<8x128xf32> -> vector<8x128xf32>
    %24 = arith.addf %20, %23 : vector<8x128xf32>
    %c0_20 = arith.constant 0 : index
    %c0_21 = arith.constant 0 : index
    %25 = vector.load %arg9[%c0_20, %c0_21] : memref<1x128xf32, #tpu.memory_space<vmem>>, vector<1x128xf32>
    %26 = vector.broadcast %25 : vector<1x128xf32> to vector<8x128xf32>
    %27 = arith.addf %24, %26 : vector<8x128xf32>
    %cst_22 = arith.constant 0.000000e+00 : f32
    %28 = vector.broadcast %cst_22 : f32 to vector<8x128xf32>
    %29 = arith.maximumf %27, %28 : vector<8x128xf32>
    %30 = arith.truncf %29 : vector<8x128xf32> to vector<8x128xbf16>
    %c0_23 = arith.constant 0 : index
    %c0_24 = arith.constant 0 : index
    %31 = vector.load %arg10[%c0_23, %c0_24] : memref<128x128xbf16, #tpu.memory_space<vmem>>, vector<128x128xbf16>
    %cst_25 = arith.constant dense<0.000000e+00> : vector<8x128xf32>
    %32 = tpu.matmul %30, %31, %cst_25 {dimension_numbers = #tpu.dot_dimension_numbers<[1], [0], [0], [1], [0, 0, 1, 1], [], []>} : vector<8x128xbf16>, vector<128x128xbf16>, vector<8x128xf32> -> vector<8x128xf32>
    %33 = vector.extract_strided_slice %32 {offsets = [0, 0], sizes = [8, 1], strides = [1, 1]} : vector<8x128xf32> to vector<8x1xf32>
    %c0_26 = arith.constant 0 : index
    %c0_27 = arith.constant 0 : index
    %34 = vector.load %arg11[%c0_26, %c0_27] : memref<1x1xf32, #tpu.memory_space<vmem>>, vector<1x1xf32>
    %35 = vector.broadcast %34 : vector<1x1xf32> to vector<8x1xf32>
    %36 = arith.addf %33, %35 : vector<8x1xf32>
    %c0_28 = arith.constant 0 : index
    %c0_29 = arith.constant 0 : index
    %37 = vector.load %arg12[%c0_28, %c0_29] : memref<8x1xf32, #tpu.memory_space<vmem>>, vector<8x1xf32>
    tpu.vector_store %arg12[%c0_28, %c0_29], %36 {strides = array<i32>} : memref<8x1xf32, #tpu.memory_space<vmem>>, vector<8x1xf32>,
    return
  }
  func.func @transform_0(%arg0: i32) -> (i32, i32) {
    %c0_i32 = arith.constant 0 : i32
    %c0_i32_0 = arith.constant 0 : i32
    return %arg0, %c0_i32 : i32, i32
  }
  func.func @transform_1(%arg0: i32) -> (i32, i32) {
    %c0_i32 = arith.constant 0 : i32
    %c0_i32_0 = arith.constant 0 : i32
    return %arg0, %c0_i32 : i32, i32
  }
  func.func @transform_2(%arg0: i32) -> (i32, i32) {
    %c0_i32 = arith.constant 0 : i32
    %c0_i32_0 = arith.constant 0 : i32
    %c0_i32_1 = arith.constant 0 : i32
    return %c0_i32, %c0_i32_0 : i32, i32
  }
  func.func @transform_3(%arg0: i32) -> (i32, i32) {
    %c0_i32 = arith.constant 0 : i32
    %c0_i32_0 = arith.constant 0 : i32
    %c0_i32_1 = arith.constant 0 : i32
    return %c0_i32, %c0_i32_0 : i32, i32
  }
  func.func @transform_4(%arg0: i32) -> (i32, i32) {
    %c0_i32 = arith.constant 0 : i32
    %c0_i32_0 = arith.constant 0 : i32
    %c0_i32_1 = arith.constant 0 : i32
    return %c0_i32, %c0_i32_0 : i32, i32
  }
  func.func @transform_5(%arg0: i32) -> (i32, i32) {
    %c0_i32 = arith.constant 0 : i32
    %c0_i32_0 = arith.constant 0 : i32
    %c0_i32_1 = arith.constant 0 : i32
    return %c0_i32, %c0_i32_0 : i32, i32
  }
  func.func @transform_6(%arg0: i32) -> (i32, i32) {
    %c0_i32 = arith.constant 0 : i32
    %c0_i32_0 = arith.constant 0 : i32
    %c0_i32_1 = arith.constant 0 : i32
    return %c0_i32, %c0_i32_0 : i32, i32
  }
  func.func @transform_7(%arg0: i32) -> (i32, i32) {
    %c0_i32 = arith.constant 0 : i32
    %c0_i32_0 = arith.constant 0 : i32
    %c0_i32_1 = arith.constant 0 : i32
    return %c0_i32, %c0_i32_0 : i32, i32
  }
  func.func @transform_8(%arg0: i32) -> (i32, i32) {
    %c0_i32 = arith.constant 0 : i32
    %c0_i32_0 = arith.constant 0 : i32
    %c0_i32_1 = arith.constant 0 : i32
    return %c0_i32, %c0_i32_0 : i32, i32
  }
  func.func @transform_9(%arg0: i32) -> (i32, i32) {
    %c0_i32 = arith.constant 0 : i32
    %c0_i32_0 = arith.constant 0 : i32
    %c0_i32_1 = arith.constant 0 : i32
    return %c0_i32, %c0_i32_0 : i32, i32
  }
  func.func @transform_10(%arg0: i32) -> (i32, i32) {
    %c0_i32 = arith.constant 0 : i32
    %c0_i32_0 = arith.constant 0 : i32
    %c0_i32_1 = arith.constant 0 : i32
    return %c0_i32, %c0_i32_0 : i32, i32
  }
  func.func @transform_11(%arg0: i32) -> (i32, i32) {
    %c0_i32 = arith.constant 0 : i32
    %c0_i32_0 = arith.constant 0 : i32
    return %arg0, %c0_i32 : i32, i32
  }
}

</mosaic_0001>

<bundles_post_ra>
// kernel: dual_input_mlp.1
= control target key start
LH: loop header
LB: loop body
LE: loop exit
PB: predicated region body
PF: predicated region fallthrough
CT: control target
= control target key end

     0   :  { %s2165_s0 = inlined_call_operand.hbm [shape: f32[16,256], index: 0, kind: input, shape index: {}]   ;;  %s2166_s1 = inlined_call_operand.hbm [shape: f32[16,256], index: 1, kind: input, shape index: {}]   ;;  %s2167_s2 = inlined_call_operand.hbm [shape: bf16[256,128], index: 2, kind: input, shape index: {}]   ;;  %s2168_s3 = inlined_call_operand.vmem [shape: f32[1,128], index: 3, kind: input, shape index: {}]   ;;  %s2169_s4 = inlined_call_operand.hbm [shape: bf16[256,128], index: 4, kind: input, shape index: {}]   ;;  %s2170_s5 = inlined_call_operand.vmem [shape: f32[1,128], index: 5, kind: input, shape index: {}]   ;;  %s2171_s6 = inlined_call_operand.hbm [shape: bf16[128,128], index: 6, kind: input, shape index: {}]   ;;  %s2172_s7 = inlined_call_operand.hbm [shape: bf16[128,128], index: 7, kind: input, shape index: {}]   ;;  %s2173_s8 = inlined_call_operand.vmem [shape: f32[1,128], index: 8, kind: input, shape index: {}]   ;;  %s2174_s9 = inlined_call_operand.hbm [shape: bf16[128,128], index: 9, kind: input, shape index: {}]   ;;  %s2175_s10 = inlined_call_operand.<no memory space> [shape: f32[1,1], index: 10, kind: input, shape index: {}]   ;;  %s2176_s11 = inlined_call_operand.vmem [shape: f32[16,1], index: 11, kind: output, shape index: {}]  }
   0x1   :  { %2177 = sst [smem:[#allocation19_spill]] %s2167_s2  ;;  %v16_v0 = vstv %s2175_s10 }
   0x2   :  { %2178 = sst [smem:[#allocation20_spill]] %s2169_s4  ;;  %17 = vst [vmem:[#allocation2] sm:$0x1] %v16_v0 }
   0x3   :  { %2179 = sst [smem:[#allocation21_spill]] %s2171_s6 }
   0x4   :  { %2180 = sst [smem:[#allocation22_spill]] %s2172_s7 }
   0x5   :  { %2181 = sst [smem:[#allocation23_spill]] %s2174_s9 }
   0x6   :  { %18 = vsyncpa [#allocation4], 0 }
   0x7   :  { %20 = vsyncpa [#allocation4 + $0x1], 0 }
   0x8   :  { %21 = vsyncpa [#allocation6], 0 }
   0x9   :  { %23 = vsyncpa [#allocation6 + $0x1], 0 }
   0xa   :  { %24 = vsyncpa [#allocation9], 0 }
   0xb   :  { %25 = vsyncpa [#allocation12], 0  ;;  %s1977_s19 = smov 0   ;;  %s1979_s20 = smov 0  }
   0xc   :  { %s1981_s21 = smov 0   ;;  %s1983_s22 = smov 0  }
   0xd LB: > { %s2182_s2 = sld [smem:[#allocation19_spill]]  ;;  %s2001_s25 = sadd.s32 4294967295, %s1905_s22   ;;  %s1905_s22 = sphi %s1983_s22, %s2194_s22   ;;  %s1901_s21 = sphi %s1981_s21, %s2193_s21   ;;  %s1897_s20 = sphi %s1979_s20, %s2192_s20   ;;  %s1893_s19 = sphi %s1977_s19, %s2191_s19  }
   0xe   : > { %p1238_p0 = scmp.ge.s32.totalorder %s1905_s22, 1  ;;  %p52_p1 = scmp.eq.s32.totalorder %s2001_s25, 0 }
   0xf   : > { %p303_p2 = scmp.lt.s32.totalorder %s1905_s22, 3  ;;  %s1907_s27 = smov [#allocation7]  }
  0x10   : > { %s316_s28 = sshll.u32 %s1907_s27, 4  ;;  %s2184_s4 = sld [smem:[#allocation20_spill]]  ;;  %s317_s28 = int_to_ptr.vmem [resolvable:$true] %s316_s28 }
  0x11   : > { %p2006_p3 = pnand %p1238_p0, %p303_p2  ;;  %s2186_s7 = sld [smem:[#allocation22_spill]] }
  0x12   : > { %s1908_s17 = smov [#allocation8]   ;;  %s1909_s10 = smov 64  }
  0x13   : > { %s314_s24 = sshll.u32 %s2182_s2, 4  ;;  %p1568_p4 = pneg %p2006_p3  ;;  %s315_s24 = int_to_ptr.hbm [resolvable:$true] %s314_s24 }
  0x14   : > { %s333_s18 = sshll.u32 %s1908_s17, 4  ;;  %s1910_s23 = smov 4   ;;  %s334_s18 = int_to_ptr.vmem [resolvable:$true] %s333_s18 }
  0x15   : > { %p2017_p5 = pnand %p1568_p4, %p52_p1  ;;  %s2187_s6 = sld [smem:[#allocation21_spill]] }
  0x16   : > { %s331_s12 = sshll.u32 %s2184_s4, 4  ;;  %s1911_s2 = smov [#allocation11]   ;;  %s332_s12 = int_to_ptr.hbm [resolvable:$true] %s331_s12 }
  0x17   : > { %s362_s16 = sshll.u32 %s2186_s7, 4  ;;  %s364_s14 = sshll.u32 %s1911_s2, 4  ;;  %s363_s16 = int_to_ptr.hbm [resolvable:$true] %s362_s16  ;;  %s365_s14 = int_to_ptr.vmem [resolvable:$true] %s364_s14 }
  0x18   : > { %1571 = dma.hbm_to_vmem [thread:$0]  (!%p2017_p5), %s315_s24, 2048, %s317_s28, [#allocation6], %s1909_s10, %s1909_s10, %s1910_s23  }
  0x19   : > { %1574 = dma.hbm_to_vmem [thread:$0]  (!%p2017_p5), %s332_s12, 2048, %s334_s18, [#allocation9], %s1909_s10, %s1909_s10, %s1910_s23  }
  0x1a   : > { %1580 = dma.hbm_to_vmem [thread:$0]  (!%p2017_p5), %s363_s16, 1024, %s365_s14, [#allocation12], %s1909_s10, %s1909_s10, %s1910_s23  }
  0x1b   : > { %s348_s30 = sshll.u32 %s2187_s6, 4  ;;  %s1912_s24 = smov [#allocation10]   ;;  %s349_s30 = int_to_ptr.hbm [resolvable:$true] %s348_s30 }
  0x1c   : > { %s350_s28 = sshll.u32 %s1912_s24, 4  ;;  %s2188_s9 = sld [smem:[#allocation23_spill]]  ;;  %s351_s28 = int_to_ptr.vmem [resolvable:$true] %s350_s28 }
  0x1d   : > { %1577 = dma.hbm_to_vmem [thread:$0]  (!%p2017_p5), %s349_s30, 1024, %s351_s28, [#allocation9], %s1909_s10, %s1909_s10, %s1910_s23  }
  0x1e   : > { %s1913_s2 = smov [#allocation13]   ;;  %s2041_s16 = sadd.s32 1, %s1905_s22  }
  0x1f   : > { %s381_s18 = sshll.u32 %s1913_s2, 4  ;;  %s35_s27 = ssub.s32 %s1905_s22, %s2041_s16  ;;  %s382_s18 = int_to_ptr.vmem [resolvable:$true] %s381_s18 }
  0x20   : > { %s38_s29 = sadd.s32 1, %s1901_s21  ;;  %p36_p6 = scmp.eq.s32.totalorder %s35_s27, 0 }
  0x21   : > { %p45_p7 = scmp.ne.s32.totalorder %s1901_s21, %s1897_s20  ;;  %p46_p8 = scmp.eq.s32.totalorder %s1905_s22, 0 }
  0x22   : > { %s379_s17 = sshll.u32 %s2188_s9, 4  ;;  %p51_p9 = scmp.ne.s32.totalorder %s1897_s20, %s1893_s19  ;;  %s380_s17 = int_to_ptr.hbm [resolvable:$true] %s379_s17 }
  0x23   : > { %1583 = dma.hbm_to_vmem [thread:$0]  (!%p2017_p5), %s380_s17, 1024, %s382_s18, [#allocation12], %s1909_s10, %s1909_s10, %s1910_s23  }
  0x24   : > { %s2052_s14 = scalar_select %p36_p6, %s1901_s21, %s38_s29  }
  0x25   : > { %p47_p10 = por %p46_p8, %p45_p7  ;;  %p2056_p11 = por %p52_p1, %p51_p9 }
  0x26   : > { %p1596_p12 = scmp.lt.s32.totalorder %s1905_s22, 2  ;;  %s398_s13 = sand.u32 1, %s1901_s21  }
  0x27   : > { %s2062_s10 = sshll.u32 %s398_s13, 4  ;;  %s1486_s23 = sshll.u32 %s1905_s22, 4 }
  0x28   : > { %s407_s12 = scalar_lea.hbm %s2165_s0, %s1486_s23  ;;  %s402_s19 = scalar_lea.vmem [#allocation3], %s2062_s10 }
  0x29   : > { %s411_s15 = sshll.u32 %s402_s19, 4  ;;  %s409_s17 = sshll.u32 %s407_s12, 4  ;;  %s412_s15 = int_to_ptr.vmem [resolvable:$true] %s411_s15  ;;  %s410_s17 = int_to_ptr.hbm [resolvable:$true] %s409_s17 }
  0x2a   : > { %p2069_p13 = pnand %p1596_p12, %p47_p10  ;;  %s427_s29 = scalar_lea.hbm %s2166_s1, %s1486_s23 }
  0x2b   : > { %s418_s4 = sand.u32 1, %s1905_s22   ;;  %s399_s6 = scalar_lea.sflag [#allocation4], %s398_s13 }
  0x2c   : > { %s1795_s7 = sshra.s32 %s410_s17, 4  ;;  %p1799_p2 = pneg %p2069_p13  ;;  %s1796_s7 = int_to_ptr.hbm [resolvable:$true] %s1795_s7 }
  0x2d   : > { %s1797_s24 = scalar_lea.hbm %s1796_s7, 16  ;;  %s1802_s19 = scalar_lea.hbm %s2165_s0, 32 }
  0x2e   : > { %p1798_p0 = scmp.ne.s32.totalorder %s1796_s7, %s1797_s24  ;;  %p1803_p6 = scmp.lt.s32.totalorder %s1796_s7, %s2165_s0 }
  0x2f   : > { %p1804_p7 = scmp.lt.s32.totalorder %s1802_s19, %s1797_s24 }
  0x30   : > { %p1800_p4 = pnand %p1799_p2, %p1798_p0 }
  0x31   : > { %p1805_p8 = por %p1804_p7, %p1803_p6 }
  0x32   : > { %p1801_p5 = pneg %p1800_p4 }
  0x34   : > { %p1806_p9 = pnand %p1805_p8, %p1801_p5 }
  0x36   : > { %1809 = shalt.err (!%p1806_p9)
}
  0x37   : > { %1587 = dma.hbm_to_vmem [thread:$0]  (!%p2069_p13), %s410_s17, 256, %s412_s15, %s399_s6  }
  0x38   : > { %s429_s22 = sshll.u32 %s427_s29, 4  ;;  %s422_s13 = scalar_lea.vmem [#allocation5], %s2062_s10  ;;  %s430_s22 = int_to_ptr.hbm [resolvable:$true] %s429_s22 }
  0x39   : > { %s431_s23 = sshll.u32 %s422_s13, 4  ;;  %s419_s28 = scalar_lea.sflag [#allocation6], %s418_s4  ;;  %s432_s23 = int_to_ptr.vmem [resolvable:$true] %s431_s23 }
  0x3a   : > { %s1825_s12 = sshra.s32 %s430_s22, 4  ;;  %s1832_s19 = scalar_lea.hbm %s2166_s1, 32  ;;  %s1826_s12 = int_to_ptr.hbm [resolvable:$true] %s1825_s12 }
  0x3b   : > { %s1827_s9 = scalar_lea.hbm %s1826_s12, 16  ;;  %p1833_p4 = scmp.lt.s32.totalorder %s1826_s12, %s2166_s1 }
  0x3c   : > { %p1828_p10 = scmp.ne.s32.totalorder %s1826_s12, %s1827_s9  ;;  %p1834_p5 = scmp.lt.s32.totalorder %s1832_s19, %s1827_s9 }
  0x3e   : > { %p1830_p12 = pnand %p1828_p10, %p1799_p2  ;;  %p1835_p6 = por %p1834_p5, %p1833_p4 }
  0x40   : > { %p1831_p0 = pneg %p1830_p12 }
  0x42   : > { %p1836_p7 = pnand %p1835_p6, %p1831_p0 }
  0x44   : > { %1839 = shalt.err (!%p1836_p7)
}
  0x45   : > { %1590 = dma.hbm_to_vmem [thread:$0]  (!%p2069_p13), %s430_s22, 256, %s432_s23, %s419_s28  }
  0x46   : > { %440 = sbr.rel (%p2006_p3) target bundleno = 533 (0x215), region = 64  ;;  %s442_s4 = sand.u32 (!%p2006_p3), 1, %s1897_s20  }
  0x47   : > { %s2105_s10 = sshll.u32 (!%p2006_p3), %s442_s4, 4  ;;  %s443_s15 = scalar_lea.sflag (!%p2006_p3), [#allocation4], %s442_s4 }
  0x48   : > { %s446_s17 = scalar_lea.vmem (!%p2006_p3), [#allocation3], %s2105_s10 }
  0x4b   : > { %1872 = dma.done.wait (%p2056_p11), %s443_s15, 256  }
  0x4c   : > { %1874 = vsyncadd (%p2056_p11), %s443_s15, 4294967040  ;;  %s452_s9 = sand.u32 1, %s2001_s25   ;;  %s456_s26 = scalar_lea.vmem [#allocation5], %s2105_s10 }
  0x4d   : > { %s453_s2 = scalar_lea.sflag [#allocation6], %s452_s9 }
  0x4e   : > { %1876 = dma.done.wait (%p2056_p11), %s453_s2, 256  }
  0x4f   : > { %1878 = vsyncadd (%p2056_p11), %s453_s2, 4294967040 }
  0x50   : > { %1880 = dma.done.wait (%p52_p1), [#allocation6], 2048  }
  0x51   : > { %1882 = vsyncadd (%p52_p1), [#allocation6], 4294965248 }
  0x52   : > { %1884 = dma.done.wait (%p52_p1), [#allocation9], 3072  }
  0x53   : > { %1886 = vsyncadd (%p52_p1), [#allocation9], 4294964224 }
  0x54   : > { %1888 = dma.done.wait (%p52_p1), [#allocation12], 2048  }
  0x55   : > { %1890 = vsyncadd (%p52_p1), [#allocation12], 4294965248  ;;  %v1495_v1 = vld [vmem:[#allocation7 + $0x38] sm:$0xff]  ;;  %v1494_v5 = vld [vmem:[#allocation7 + $0x30] sm:$0xff]  ;;  %p525_p1 = scmp.lt.s32.totalorder %s2001_s25, 1  ;;  %vm1100_vm0 = vcmask 7168  }
  0x56   : > { %v1503_v2 = vld [vmem:[#allocation7 + $0x78] sm:$0xff]  ;;  %669 = vmatpush.bf16.msra.mxu0 %v1495_v1  ;;  %v1502_v6 = vld [vmem:[#allocation7 + $0x70] sm:$0xff]  ;;  %v1493_v9 = vld [vmem:[#allocation7 + $0x28] sm:$0xff] }
  0x57   : > { %v1511_v3 = vld [vmem:[#allocation8 + $0x38] sm:$0xff]  ;;  %682 = vmatpush.bf16.msra.mxu1 %v1503_v2  ;;  %v1510_v7 = vld [vmem:[#allocation8 + $0x30] sm:$0xff]  ;;  %v1501_v10 = vld [vmem:[#allocation7 + $0x68] sm:$0xff]  ;;  %s2196_s25 = smov (!%p525_p1, %s2001_s25), 1 }
  0x58   : > { %v1519_v4 = vld [vmem:[#allocation8 + $0x78] sm:$0xff]  ;;  %828 = vmatpush.bf16.msra.mxu2 %v1511_v3  ;;  %v1518_v8 = vld [vmem:[#allocation8 + $0x70] sm:$0xff]  ;;  %v1509_v11 = vld [vmem:[#allocation8 + $0x28] sm:$0xff]  ;;  %s1259_s28 = sshll.u32 %s2196_s25, 3 }
  0x59   : > { %841 = vmatpush.bf16.msra.mxu3 %v1519_v4  ;;  %v1517_v12 = vld [vmem:[#allocation8 + $0x68] sm:$0xff]  ;;  %v1492_v13 = vld [vmem:[#allocation7 + $0x20] sm:$0xff]  ;;  %v1491_v17 = vld [vmem:[#allocation7 + $0x18] sm:$0xff]  ;;  %s528_s24 = scalar_lea.vmem %s2176_s11, %s1259_s28 }
  0x5a   : > { %670 = vmatpush.bf16.msra.mxu0 %v1494_v5  ;;  %v1500_v14 = vld [vmem:[#allocation7 + $0x60] sm:$0xff]  ;;  %v1499_v18 = vld [vmem:[#allocation7 + $0x58] sm:$0xff]  ;;  %v1490_v21 = vld [vmem:[#allocation7 + $0x10] sm:$0xff] }
  0x5b   : > { %683 = vmatpush.bf16.msra.mxu1 %v1502_v6  ;;  %v1508_v15 = vld [vmem:[#allocation8 + $0x20] sm:$0xff]  ;;  %v1507_v19 = vld [vmem:[#allocation8 + $0x18] sm:$0xff]  ;;  %v1498_v22 = vld [vmem:[#allocation7 + $0x50] sm:$0xff] }
  0x5c   : > { %829 = vmatpush.bf16.msra.mxu2 %v1510_v7  ;;  %v1516_v16 = vld [vmem:[#allocation8 + $0x60] sm:$0xff]  ;;  %v1515_v20 = vld [vmem:[#allocation8 + $0x58] sm:$0xff]  ;;  %v1506_v23 = vld [vmem:[#allocation8 + $0x10] sm:$0xff] }
  0x5d   : > { %842 = vmatpush.bf16.msra.mxu3 %v1518_v8  ;;  %v1514_v24 = vld [vmem:[#allocation8 + $0x50] sm:$0xff]  ;;  %v1489_v25 = vld [vmem:[#allocation7 + $0x8] sm:$0xff]  ;;  %v1488_v29 = vld [vmem:[#allocation7] sm:$0xff] }
  0x5e   : > { %671 = vmatpush.bf16.msra.mxu0 %v1493_v9  ;;  %v1497_v26 = vld [vmem:[#allocation7 + $0x48] sm:$0xff]  ;;  %v1496_v30 = vld [vmem:[#allocation7 + $0x40] sm:$0xff]  ;;  %v1527_v37 = vld [vmem:[#allocation10 + $0x38] sm:$0xff] }
  0x5f   : > { %684 = vmatpush.bf16.msra.mxu1 %v1501_v10  ;;  %v1505_v27 = vld [vmem:[#allocation8 + $0x8] sm:$0xff]  ;;  %v1504_v31 = vld [vmem:[#allocation8] sm:$0xff]  ;;  %v1535_v38 = vld [vmem:[#allocation11 + $0x38] sm:$0xff] }
  0x60   : > { %830 = vmatpush.bf16.msra.mxu2 %v1509_v11  ;;  %v1513_v28 = vld [vmem:[#allocation8 + $0x48] sm:$0xff]  ;;  %v529_v32 = vld [vmem:[%s446_s17] sm:$0xff]  ;;  %v1523_v49 = vld [vmem:[#allocation10 + $0x18] sm:$0xff] }
  0x61   : > { %843 = vmatpush.bf16.msra.mxu3 %v1517_v12  ;;  %v530_v33 = vld [vmem:[%s446_s17 + $0x8] sm:$0xff]  ;;  %v1512_v34 = vld [vmem:[#allocation8 + $0x40] sm:$0xff]  ;;  %v531_v39 = vpack.c.bf16 %v529_v32, %v529_v32  ;;  %v1526_v43 = vld [vmem:[#allocation10 + $0x30] sm:$0xff] }
  0x62   : > { %672 = vmatpush.bf16.msra.mxu0 %v1492_v13  ;;  %v533_v35 = vld [vmem:[%s456_s26] sm:$0xff]  ;;  %v534_v36 = vld [vmem:[%s456_s26 + $0x8] sm:$0xff]  ;;  %v532_v40 = vpack.c.bf16 %v530_v33, %v530_v33 }
  0x63   : > { %685 = vmatpush.bf16.msra.mxu1 %v1500_v14  ;;  %v535_v41 = vpack.c.bf16 %v533_v35, %v533_v35  ;;  %v536_v42 = vpack.c.bf16 %v534_v36, %v534_v36  ;;  %v1534_v44 = vld [vmem:[#allocation11 + $0x30] sm:$0xff]  ;;  %v1525_v45 = vld [vmem:[#allocation10 + $0x28] sm:$0xff]  ;;  %v1524_v47 = vld [vmem:[#allocation10 + $0x20] sm:$0xff] }
  0x64   : > { %831 = vmatpush.bf16.msra.mxu2 %v1508_v15  ;;  %v1533_v46 = vld [vmem:[#allocation11 + $0x28] sm:$0xff]  ;;  %v1532_v48 = vld [vmem:[#allocation11 + $0x20] sm:$0xff]  ;;  %v1522_v50 = vld [vmem:[#allocation10 + $0x10] sm:$0xff] }
  0x65   : > { %844 = vmatpush.bf16.msra.mxu3 %v1516_v16  ;;  %v1531_v51 = vld [vmem:[#allocation11 + $0x18] sm:$0xff]  ;;  %v1521_v52 = vld [vmem:[#allocation10 + $0x8] sm:$0xff]  ;;  %v1530_v53 = vld [vmem:[#allocation11 + $0x10] sm:$0xff] }
  0x66   : > { %673 = vmatpush.bf16.msra.mxu0 %v1491_v17  ;;  %v1520_v54 = vld [vmem:[#allocation10] sm:$0xff]  ;;  %v1529_v55 = vld [vmem:[#allocation11 + $0x8] sm:$0xff]  ;;  %v1543_v57 = vld [vmem:[#allocation13 + $0x38] sm:$0xff] }
  0x67   : > { %686 = vmatpush.bf16.msra.mxu1 %v1499_v18  ;;  %v1528_v56 = vld [vmem:[#allocation11] sm:$0xff]  ;;  %v1542_v58 = vld [vmem:[#allocation13 + $0x30] sm:$0xff]  ;;  %v1541_v59 = vld [vmem:[#allocation13 + $0x28] sm:$0xff] }
  0x68   : > { %832 = vmatpush.bf16.msra.mxu2 %v1507_v19  ;;  %v1540_v60 = vld [vmem:[#allocation13 + $0x20] sm:$0xff]  ;;  %v1641_v61 = vld [vmem:[%s2168_s3] ss:$0 sm:$0xff]  ;;  %v1538_v16 = vld [vmem:[#allocation13 + $0x10] sm:$0xff] }
  0x69   : > { %845 = vmatpush.bf16.msra.mxu3 %v1515_v20  ;;  %v1642_v2 = vld [vmem:[%s2170_s5] ss:$0 sm:$0xff]  ;;  %v1537_v17 = vld [vmem:[#allocation13 + $0x8] sm:$0xff]  ;;  %v1536_v18 = vld [vmem:[#allocation13] sm:$0xff] }
  0x6a   : > { %674 = vmatpush.bf16.msra.mxu0 %v1490_v21  ;;  %v1539_v15 = vld [vmem:[#allocation13 + $0x18] sm:$0xff] }
  0x6b   : > { %687 = vmatpush.bf16.msra.mxu1 %v1498_v22  ;;  %v1643_v20 = vld [vmem:[%s2173_s8] ss:$0 sm:$0xff] }
  0x6c   : > { %833 = vmatpush.bf16.msra.mxu2 %v1506_v23 }
  0x6d   : > { %846 = vmatpush.bf16.msra.mxu3 %v1514_v24 }
  0x6e   : > { %675 = vmatpush.bf16.msra.mxu0 %v1489_v25 }
  0x6f   : > { %688 = vmatpush.bf16.msra.mxu1 %v1497_v26 }
  0x70   : > { %834 = vmatpush.bf16.msra.mxu2 %v1505_v27 }
  0x71   : > { %847 = vmatpush.bf16.msra.mxu3 %v1513_v28  ;;  %v1644_v28 = vld [vmem:[#allocation2] ss:$0 sm:$0xff] }
  0x72   : > { %676 = vmatpush.bf16.msra.mxu0 %v1488_v29 }
  0x73   : > { %689 = vmatpush.bf16.msra.mxu1 %v1496_v30 }
  0x74   : > { %835 = vmatpush.bf16.msra.mxu2 %v1504_v31 }
  0x75   : > { %848 = vmatpush.bf16.msra.mxu3 %v1512_v34  ;;  %677 = vmatmul.bf16.vlgmr.msra.gmra.mxu0 %v531_v39 }
  0x76   : > { %937 = vmatpush.bf16.msrb.mxu0 %v1535_v38  ;;  %690 = vmatmul.bf16.vlgmr.msra.gmra.mxu1 %v532_v40 }
  0x77   : > { %998 = vmatpush.bf16.msrb.mxu1 %v1527_v37  ;;  %836 = vmatmul.bf16.vlgmr.msra.gmra.mxu2 %v535_v41 }
  0x78   : > { %849 = vmatmul.bf16.vlgmr.msra.gmra.mxu3 %v536_v42  ;;  %1082 = vmatpush.bf16.msrb.mxu2 %v1543_v57 }
  0x7a   : > { %938 = vmatpush.bf16.msrb.mxu0 %v1534_v44 }
  0x7b   : > { %999 = vmatpush.bf16.msrb.mxu1 %v1526_v43 }
  0x7c   : > { %1083 = vmatpush.bf16.msrb.mxu2 %v1542_v58 }
  0x7e   : > { %939 = vmatpush.bf16.msrb.mxu0 %v1533_v46 }
  0x7f   : > { %1000 = vmatpush.bf16.msrb.mxu1 %v1525_v45 }
  0x80   : > { %1084 = vmatpush.bf16.msrb.mxu2 %v1541_v59 }
  0x82   : > { %940 = vmatpush.bf16.msrb.mxu0 %v1532_v48 }
  0x83   : > { %1001 = vmatpush.bf16.msrb.mxu1 %v1524_v47 }
  0x84   : > { %1085 = vmatpush.bf16.msrb.mxu2 %v1540_v60 }
  0x86   : > { %941 = vmatpush.bf16.msrb.mxu0 %v1531_v51 }
  0x87   : > { %1002 = vmatpush.bf16.msrb.mxu1 %v1523_v49 }
  0x88   : > { %1086 = vmatpush.bf16.msrb.mxu2 %v1539_v15 }
  0x8a   : > { %942 = vmatpush.bf16.msrb.mxu0 %v1530_v53 }
  0x8b   : > { %1003 = vmatpush.bf16.msrb.mxu1 %v1522_v50 }
  0x8c   : > { %1087 = vmatpush.bf16.msrb.mxu2 %v1538_v16 }
  0x8e   : > { %943 = vmatpush.bf16.msrb.mxu0 %v1529_v55 }
  0x8f   : > { %1004 = vmatpush.bf16.msrb.mxu1 %v1521_v52 }
  0x90   : > { %1088 = vmatpush.bf16.msrb.mxu2 %v1537_v17 }
  0x92   : > { %944 = vmatpush.bf16.msrb.mxu0 %v1528_v56 }
  0x93   : > { %1005 = vmatpush.bf16.msrb.mxu1 %v1520_v54 }
  0x94   : > { %1089 = vmatpush.bf16.msrb.mxu2 %v1536_v18 }
  0xf2   : > { %v678_v62 = vpop.f32.mrf.mxu0 }
  0xf3   : > { %v691_v63 = vpop.f32.mrf.mxu1  ;;  %v679_v0 = vadd.f32 %v1641_v61, %v678_v62 }
  0xf5   : > { %v692_v1 = vadd.f32 %v691_v63, %v679_v0 }
  0xf7   : > { %v695_v3 = vmax.f32 %v692_v1, 0.0 }
  0xf9   : > { %v855_v4 = vpack.c.bf16 %v695_v3, %v695_v3 }
  0xfa   : > { %v837_v5 = vpop.f32.mrf.mxu2  ;;  %v680_v8 = vpop.f32.mrf.mxu0 }
  0xfb   : > { %v850_v6 = vpop.f32.mrf.mxu3  ;;  %v838_v7 = vadd.f32 %v1642_v2, %v837_v5  ;;  %v693_v9 = vpop.f32.mrf.mxu1  ;;  %1006 = vmatmul.bf16.vlgmr.msrb.gmra.mxu1 %v855_v4 }
  0xfd   : > { %v851_v10 = vadd.f32 %v850_v6, %v838_v7 }
  0xff   : > { %v854_v11 = vmax.f32 %v851_v10, 0.0 }
 0x101   : > { %v872_v12 = vpack.c.bf16 %v854_v11, %v854_v11 }
 0x102   : > { %v839_v13 = vpop.f32.mrf.mxu2 }
 0x103   : > { %v852_v14 = vpop.f32.mrf.mxu3  ;;  %945 = vmatmul.bf16.vlgmr.msrb.gmra.mxu0 %v872_v12 }
 0x178   : > { %v1007_v19 = vpop.f32.mrf.mxu1 }
 0x180   : > { %v946_v21 = vpop.f32.mrf.mxu0  ;;  %v1009_v23 = vpop.f32.mrf.mxu1 }
 0x181   : > { %v1008_v22 = vadd.f32 %v1007_v19, %v946_v21 }
 0x183   : > { %v1015_v24 = vadd.f32 %v1643_v20, %v1008_v22 }
 0x185   : > { %v1016_v25 = vmax.f32 %v1015_v24, 0.0 }
 0x187   : > { %v1017_v26 = vpack.c.bf16 %v1016_v25, %v1016_v25 }
 0x188   : > { %v948_v27 = vpop.f32.mrf.mxu0 }
 0x189   : > { %1090 = vmatmul.bf16.vlgmr.msrb.gmra.mxu2 %v1017_v26 }
 0x20c   : > { %v1091_v29 = vpop.f32.mrf.mxu2 }
 0x20d   : > { %v1099_v30 = vadd.f32 %v1644_v28, %v1091_v29 }
 0x20f   : > { %1101 = vst.msk [vmem:[%s528_s24] sm:$0xff] %vm1100_vm0, %v1099_v30 }
 0x214   : > { %v1093_v31 = vpop.f32.mrf.mxu2 }
 0x215 PF: > { %p28_p3 = scmp.ge.s32.totalorder %s2041_s16, 4   ;;  %s2191_s19 = smov %s1897_s20 }
 0x216   : > { %s2192_s20 = smov %s1901_s21  ;;  %s2193_s21 = smov %s2052_s14 }
 0x217   : > { %s2194_s22 = smov %s2041_s16  ;;  %30 = sbr.rel (!%p28_p3) target bundleno = 13 (0xd), region = 137 }
 0x21c   :  { %1121 = vsyncpa [#allocation4], 1 }
 0x21d   :  { %1123 = vsyncpa [#allocation4 + $0x1], 1 }
 0x21e   :  { %1124 = vsyncpa [#allocation6], 1 }
 0x21f   :  { %1126 = vsyncpa [#allocation6 + $0x1], 1 }
 0x220   :  { %1127 = vsyncpa [#allocation9], 1 }
 0x221   :  { %1128 = vsyncpa [#allocation12], 1 }

</bundles_post_ra>
